<compile_context>
chip_gen: v6e
topology: v6e:2x2x1
jax: 0.10.0
libtpu: 0.0.40
codegen_flags: <defaults>
</compile_context>

<pallas_src>
import functools

import jax
import jax.numpy as jnp
from jax.experimental import pallas as pl
from jax.experimental.pallas import tpu as pltpu


# 4096 rows x 128 lanes x 4 B = 2 MiB per f32 input block; with 2 inputs x 2
# pipeline buffers that is ~8 MiB of VMEM — large enough to run near the HBM
# roofline on v5e/v6e/v7x, small enough for every generation's VMEM budget.
_DEFAULT_MAX_BLOCK_ROWS = 4096


def _partial_sqdiff_kernel(x_ref, t_ref, partial_ref, *, block_rows,
                           total_rows, needs_mask):
    """Per-lane partial sums of (x - t)^2 over one (block_rows, 128) tile."""
    diff = x_ref[...].astype(jnp.float32) - t_ref[...].astype(jnp.float32)
    sq = diff * diff
    if needs_mask:
        # The final block may extend past the real row count; zero out the
        # garbage rows so they contribute nothing to the sum.
        row = jax.lax.broadcasted_iota(jnp.int32, (block_rows, 1), 0)
        global_row = pl.program_id(0) * block_rows + row
        sq = jnp.where(global_row < total_rows, sq, 0.0)
    # Reduce over sublanes only (lane-dense result); cross-lane + cross-block
    # reduction is finished cheaply in plain JAX outside the kernel.
    partial_ref[...] = jnp.sum(sq, axis=0, keepdims=True)


def content_loss(x, target, *, max_block_rows=_DEFAULT_MAX_BLOCK_ROWS):
    """Returns (x passed through unchanged, scalar MSE(x, target))."""
    assert x.shape == target.shape, (x.shape, target.shape)
    total = x.size

    xf = x.reshape(-1)
    tf = target.reshape(-1)

    # Lane-align: pad BOTH operands identically with zeros (zero contribution
    # to the squared-difference sum) so the data can be viewed as (rows, 128).
    pad = (-total) % 128
    if pad:
        xf = jnp.pad(xf, (0, pad))
        tf = jnp.pad(tf, (0, pad))
    rows = (total + pad) // 128
    x2 = xf.reshape(rows, 128)
    t2 = tf.reshape(rows, 128)

    if rows <= max_block_rows:
        block_rows = rows                      # full-dim block: always legal
    else:
        assert max_block_rows % 8 == 0, "block rows must be a multiple of 8"
        block_rows = max_block_rows
    num_blocks = pl.cdiv(rows, block_rows)
    needs_mask = (rows % block_rows) != 0      # ragged tail block?

    kernel = functools.partial(
        _partial_sqdiff_kernel,
        block_rows=block_rows,
        total_rows=rows,
        needs_mask=needs_mask,
    )

    partials = pl.pallas_call(
        kernel,
        out_shape=jax.ShapeDtypeStruct((num_blocks, 128), jnp.float32),
        grid_spec=pltpu.PrefetchScalarGridSpec(
            num_scalar_prefetch=0,
            grid=(num_blocks,),
            in_specs=[
                pl.BlockSpec((block_rows, 128), lambda i: (i, 0)),
                pl.BlockSpec((block_rows, 128), lambda i: (i, 0)),
            ],
            out_specs=pl.BlockSpec((1, 128), lambda i: (i, 0)),
        ),
        compiler_params=pltpu.CompilerParams(
            # Every block is independent -> shard across both TCs on v7x.
            dimension_semantics=("parallel",),
            vmem_limit_bytes=32 * 1024 * 1024,
        ),
    )(x2, t2)

    loss = jnp.sum(partials) * jnp.float32(1.0 / total)
    # Identity pass-through happens in the wrapper: no extra HBM write.
    return x, loss


class ContentLossPallas:
    """Mirror of the PyTorch module: captures `target` at init, stores `.loss`.

    Note: `.loss` is plain Python state; under an enclosing jax.jit it will
    hold a tracer (same caveat as any side-stored value).
    """

    def __init__(self, target):
        self.target = jax.lax.stop_gradient(target)   # target.detach()
        self.loss = None

    def __call__(self, x):
        out, self.loss = content_loss(x, self.target)
        return out


if __name__ == "__main__":
    key = jax.random.PRNGKey(0)
    k_in, k_tgt, k_in2, k_tgt2 = jax.random.split(key, 4)

    # Primary check: small NCHW feature map (lane-aligned fast path).
    shape = (2, 4, 16, 16)
    x = jax.random.normal(k_in, shape, dtype=jnp.float32)
    target = jax.random.normal(k_tgt, shape, dtype=jnp.float32)

    module = ContentLossPallas(target)
    y = jax.block_until_ready(module(x))
    loss = jax.block_until_ready(module.loss)

    ref_loss = jnp.mean((x - target) ** 2)
    assert jnp.allclose(y, x), "pass-through mismatch"
    assert jnp.allclose(loss, ref_loss, rtol=1e-5, atol=1e-6), (
        f"loss mismatch: {loss} vs {ref_loss}"
    )

    # Secondary check: awkward (non-128-divisible) shape with a forced
    # multi-block grid and a masked ragged tail block (pad + mask paths).
    shape2 = (2, 3, 20, 20)     # 2400 elems -> pad to 2432 -> 19 rows of 128
    x2 = jax.random.normal(k_in2, shape2, dtype=jnp.float32)
    t2 = jax.random.normal(k_tgt2, shape2, dtype=jnp.float32)
    y2, loss2 = content_loss(x2, t2, max_block_rows=8)   # grid=3, masked tail
    loss2 = jax.block_until_ready(loss2)
    ref2 = jnp.mean((x2 - t2) ** 2)
    assert jnp.allclose(y2, x2), "pass-through mismatch (awkward shape)"
    assert jnp.allclose(loss2, ref2, rtol=1e-5, atol=1e-6), (
        f"loss mismatch (awkward shape): {loss2} vs {ref2}"
    )

    print("KERNEL_OK")
</pallas_src>

<mosaic_0001>
module attributes {stable_mosaic.version = 11 : i64} {
  func.func @_partial_sqdiff_kernel(%arg0: i32, %arg1: memref<16x128xf32, #tpu.memory_space<vmem>>, %arg2: memref<16x128xf32, #tpu.memory_space<vmem>>, %arg3: memref<1x128xf32, #tpu.memory_space<vmem>>) attributes {dimension_semantics = [#tpu.dimension_semantics<parallel>], iteration_bounds = array<i64: 1>, scalar_prefetch = 0 : i64, scratch_operands = 0 : i64, tpu.core_type = #tpu.core_type<tc>, window_params = [{transform_indices = @transform_0, window_bounds = array<i64: 16, 128>}, {transform_indices = @transform_1, window_bounds = array<i64: 16, 128>}, {transform_indices = @transform_2, window_bounds = array<i64: 1, 128>}]} {
    %c0 = arith.constant 0 : index
    %c0_0 = arith.constant 0 : index
    %0 = vector.load %arg1[%c0, %c0_0] : memref<16x128xf32, #tpu.memory_space<vmem>>, vector<16x128xf32>
    %c0_1 = arith.constant 0 : index
    %c0_2 = arith.constant 0 : index
    %1 = vector.load %arg2[%c0_1, %c0_2] : memref<16x128xf32, #tpu.memory_space<vmem>>, vector<16x128xf32>
    %2 = arith.subf %0, %1 : vector<16x128xf32>
    %3 = arith.mulf %2, %2 : vector<16x128xf32>
    %cst = arith.constant dense<0.000000e+00> : vector<128xf32>
    %4 = vector.multi_reduction <add>, %3, %cst [0] : vector<16x128xf32> to vector<128xf32>
    %5 = vector.shape_cast %4 : vector<128xf32> to vector<1x128xf32>
    %c0_3 = arith.constant 0 : index
    %c0_4 = arith.constant 0 : index
    %6 = vector.load %arg3[%c0_3, %c0_4] : memref<1x128xf32, #tpu.memory_space<vmem>>, vector<1x128xf32>
    tpu.vector_store %arg3[%c0_3, %c0_4], %5 {strides = array<i32>} : memref<1x128xf32, #tpu.memory_space<vmem>>, vector<1x128xf32>,
    return
  }
  func.func @transform_0(%arg0: i32) -> (i32, i32) {
    %c0_i32 = arith.constant 0 : i32
    %c0_i32_0 = arith.constant 0 : i32
    return %arg0, %c0_i32 : i32, i32
  }
  func.func @transform_1(%arg0: i32) -> (i32, i32) {
    %c0_i32 = arith.constant 0 : i32
    %c0_i32_0 = arith.constant 0 : i32
    return %arg0, %c0_i32 : i32, i32
  }
  func.func @transform_2(%arg0: i32) -> (i32, i32) {
    %c0_i32 = arith.constant 0 : i32
    %c0_i32_0 = arith.constant 0 : i32
    return %arg0, %c0_i32 : i32, i32
  }
}

</mosaic_0001>

<bundles_post_ra>
// kernel: tpu_custom_call.1
= control target key start
LH: loop header
LB: loop body
LE: loop exit
PB: predicated region body
PF: predicated region fallthrough
CT: control target
= control target key end

     0   :  { %7 = vsyncpa [#allocation3], 0  ;;  %s172_s0 = inlined_call_operand.hbm [shape: f32[16,128], index: 0, kind: input, shape index: {}]   ;;  %s173_s1 = inlined_call_operand.hbm [shape: f32[16,128], index: 1, kind: input, shape index: {}]   ;;  %s174_s2 = inlined_call_operand.hbm [shape: f32[1,128], index: 2, kind: output, shape index: {}]  }
   0x1   :  { %8 = vsyncpa [#allocation6], 0 }
   0x2   :  { %9 = vsyncpa [#allocation4], 0  ;;  %s143_s9 = smov [#allocation2]  }
   0x3   :  { %s15_s10 = sshll.u32 %s143_s9, 4  ;;  %s16_s10 = int_to_ptr.vmem [resolvable:$true] %s15_s10 }
   0x4   :  { %s85_s11 = scalar_lea.vmem %s16_s10, 256  ;;  %p90_p1 = scmp.lt.s32.totalorder %s16_s10, %s16_s10 }
   0x5   :  { %p86_p0 = scmp.ne.s32.totalorder %s16_s10, %s85_s11  ;;  %p91_p2 = scmp.lt.s32.totalorder %s85_s11, %s85_s11 }
   0x7   :  { %p92_p3 = por %p91_p2, %p90_p1 }
   0x9   :  { %p93_p4 = pnand %p92_p3, %p86_p0 }
   0xb   :  { %96 = shalt.err (!%p93_p4)
}
   0xc   :  { %s144_s12 = smov 128   ;;  %s145_s13 = smov 8  }
   0xd   :  { %21 = dma.hbm_to_vmem [thread:$0]  %s172_s0, 256, %s16_s10, [#allocation3], %s144_s12, %s144_s12, %s145_s13  }
   0xe   :  { %s146_s16 = smov [#allocation5]  }
   0xf   :  { %s27_s17 = sshll.u32 %s146_s16, 4  ;;  %s28_s17 = int_to_ptr.vmem [resolvable:$true] %s27_s17 }
  0x10   :  { %s105_s18 = scalar_lea.vmem %s28_s17, 256  ;;  %p110_p6 = scmp.lt.s32.totalorder %s28_s17, %s28_s17 }
  0x11   :  { %p106_p5 = scmp.ne.s32.totalorder %s28_s17, %s105_s18  ;;  %p111_p7 = scmp.lt.s32.totalorder %s105_s18, %s105_s18 }
  0x13   :  { %p112_p8 = por %p111_p7, %p110_p6 }
  0x15   :  { %p113_p9 = pnand %p112_p8, %p106_p5 }
  0x17   :  { %116 = shalt.err (!%p113_p9)
}
  0x18   :  { %33 = dma.hbm_to_vmem [thread:$0]  %s173_s1, 256, %s28_s17, [#allocation6], %s144_s12, %s144_s12, %s145_s13  }
  0x19   :  { %137 = dma.done.wait [#allocation3], 256  }
  0x1a   :  { %138 = vsyncadd [#allocation3], 4294967040 }
  0x1b   :  { %139 = dma.done.wait [#allocation6], 256  }
  0x1c   :  { %140 = vsyncadd [#allocation6], 4294967040  ;;  %v40_v0 = vld [vmem:[#allocation2] sm:$0xff]  ;;  %v41_v1 = vld [vmem:[#allocation2 + $0x8] sm:$0xff]  ;;  %s147_s0 = smov [#allocation7]  }
  0x1d   :  { %v42_v2 = vld [vmem:[#allocation5] sm:$0xff]  ;;  %v43_v3 = vld [vmem:[#allocation5 + $0x8] sm:$0xff]  ;;  %s62_s21 = sshll.u32 %s147_s0, 4  ;;  %s63_s21 = int_to_ptr.vmem [resolvable:$true] %s62_s21 }
  0x1e   :  { %v44_v4 = vsub.f32 %v40_v0, %v42_v2  ;;  %v45_v5 = vsub.f32 %v41_v1, %v43_v3  ;;  %s117_s1 = scalar_lea.vmem %s63_s21, 16  ;;  %s121_s22 = scalar_lea.vmem %s63_s21, 32 }
  0x1f   :  { %p118_p10 = scmp.ne.s32.totalorder %s63_s21, %s117_s1  ;;  %p122_p11 = scmp.lt.s32.totalorder %s63_s21, %s63_s21 }
  0x20   :  { %v46_v6 = vmul.f32 %v44_v4, %v44_v4  ;;  %v47_v7 = vmul.f32 %v45_v5, %v45_v5  ;;  %p123_p12 = scmp.lt.s32.totalorder %s121_s22, %s117_s1 }
  0x22   :  { %v48_v8 = vadd.f32 %v47_v7, %v46_v6  ;;  %p124_p13 = por %p123_p12, %p122_p11 }
  0x24   :  { %v49_v9 = vrot.slane %v48_v8, 4  ;;  %p125_p0 = pnand %p124_p13, %p118_p10 }
  0x26   :  { %v50_v10 = vadd.f32 %v49_v9, %v48_v8 }
  0x28   :  { %v51_v11 = vrot.slane %v50_v10, 2 }
  0x2a   :  { %v52_v12 = vadd.f32 %v51_v11, %v50_v10 }
  0x2c   :  { %v53_v13 = vrot.slane %v52_v12, 1 }
  0x2e   :  { %v54_v14 = vadd.f32 %v53_v13, %v52_v12 }
  0x30   :  { %55 = vst [vmem:[#allocation7] sm:$0x1] %v54_v14 }
  0x31   :  { %128 = shalt.err (!%p125_p0)
}
  0x32   :  { %65 = dma.vmem_to_hbm [thread:$0]  %s63_s21, 16, %s174_s2, [#allocation4]  }
  0x33   :  { %141 = dma.done.wait [#allocation4], 16  }
  0x34   :  { %142 = vsyncadd [#allocation4], 4294967280 }
  0x35   :  { %69 = vsyncpa [#allocation3], 1 }
  0x36   :  { %70 = vsyncpa [#allocation6], 1 }
  0x37   :  { %71 = vsyncpa [#allocation4], 1 }

</bundles_post_ra>
